<compile_context>
chip_gen: v6e
topology: v6e:2x2x1
jax: 0.10.0
libtpu: 0.0.40
codegen_flags: <defaults>
</compile_context>

<pallas_src>
import functools
import math

import jax
import jax.numpy as jnp
import numpy as np
from jax.experimental import pallas as pl
from jax.experimental.pallas import tpu as pltpu

EPS = 1e-5


def _layernorm(x, g, b, eps=EPS):
    # Matches the PyTorch LayerNorm in the module exactly:
    #   std uses the unbiased estimator (N-1 divisor) like torch.std,
    #   and the normalization divides by (std + eps), NOT sqrt(var + eps).
    d = x.shape[-1]
    mean = jnp.mean(x, axis=-1, keepdims=True)
    var = jnp.sum((x - mean) ** 2, axis=-1, keepdims=True) / (d - 1)
    std = jnp.sqrt(var)
    return g * (x - mean) / (std + eps) + b


def encoder_layer_kernel(x_ref, mask_ref,
                         wqkv_ref, bqkv_ref, wo_ref, bo_ref,
                         g1_ref, be1_ref,
                         w1_ref, c1_ref, w2_ref, c2_ref,
                         g2_ref, be2_ref,
                         *rest, head_num, fuse_final_norm):
    if fuse_final_norm:
        gf_ref, bf_ref, o_ref = rest
    else:
        (o_ref,) = rest

    x = x_ref[0]              # (S, D)
    mask = mask_ref[0]        # (1, S) or (S, S); broadcasts against (H, S, S) scores
    S, D = x.shape
    H = head_num
    dk = D // H
    scale = 1.0 / math.sqrt(dk)

    # ---- fused, head-batched QKV projection: one batched MXU contraction ----
    # wqkv_ref: (H, D, 3*dk)  (per-head [Wq | Wk | Wv]),  bqkv_ref: (H, 1, 3*dk)
    xb = jnp.broadcast_to(x[None, :, :], (H, S, D))
    qkv = jnp.einsum('hsd,hde->hse', xb, wqkv_ref[...],
                     preferred_element_type=jnp.float32) + bqkv_ref[...]   # (H, S, 3*dk)
    q = qkv[:, :, :dk]
    k = qkv[:, :, dk:2 * dk]
    v = qkv[:, :, 2 * dk:]

    # ---- head-batched scaled dot-product attention (no per-head loop, no concat) ----
    scores = jnp.einsum('hsd,htd->hst', q, k,
                        preferred_element_type=jnp.float32) * scale        # (H, S, S)
    scores = jnp.where(mask[None, :, :] == 0, -1e9, scores)
    m = jnp.max(scores, axis=-1, keepdims=True)
    p = jnp.exp(scores - m)
    attn = p / jnp.sum(p, axis=-1, keepdims=True)
    ctx = jnp.einsum('hst,htd->hsd', attn, v,
                     preferred_element_type=jnp.float32)                   # (H, S, dk)

    # ---- output projection: per-head partial products summed (wo_ref: (H, dk, D)) ----
    a_heads = jnp.einsum('hsd,hdj->hsj', ctx, wo_ref[...],
                         preferred_element_type=jnp.float32)               # (H, S, D)
    a = jnp.sum(a_heads, axis=0) + bo_ref[0]                               # (S, D)
    t = _layernorm(x + a, g1_ref[0], be1_ref[0])

    # ---- FeedForward (relu) + add & norm ----
    hdn = jnp.maximum(
        jnp.dot(t, w1_ref[...], preferred_element_type=jnp.float32) + c1_ref[0], 0.0)
    z = jnp.dot(hdn, w2_ref[...], preferred_element_type=jnp.float32) + c2_ref[0]
    y = _layernorm(t + z, g2_ref[0], be2_ref[0])

    # ---- Encoder's final LayerNorm fused into the last layer ----
    if fuse_final_norm:
        y = _layernorm(y, gf_ref[0], bf_ref[0])
    o_ref[0] = y


def pack_layer_params(p, head_num):
    """Host-side repacking of torch-style (D,D)/(1,D) params into head-batched tensors."""
    (wq, bq, wk, bk, wv, bv, wo, bo, g1, be1, w1, c1, w2, c2, g2, be2) = p
    D = wq.shape[0]
    dk = D // head_num

    def split_w(w):   # (D, D) -> (H, D, dk)
        return jnp.transpose(w.reshape(D, head_num, dk), (1, 0, 2))

    def split_b(b):   # (1, D) -> (H, 1, dk)
        return b.reshape(head_num, dk)[:, None, :]

    wqkv = jnp.concatenate([split_w(wq), split_w(wk), split_w(wv)], axis=-1)  # (H, D, 3dk)
    bqkv = jnp.concatenate([split_b(bq), split_b(bk), split_b(bv)], axis=-1)  # (H, 1, 3dk)
    wo_h = wo.reshape(head_num, dk, D)                                        # (H, dk, D)
    return (wqkv, bqkv, wo_h, bo, g1, be1, w1, c1, w2, c2, g2, be2)


def _run_layer(x, mask, packed, head_num, final_norm=None):
    B, S, D = x.shape
    Ms = mask.shape[1]
    params = list(packed)
    fuse = final_norm is not None
    if fuse:
        params = params + list(final_norm)

    kernel = functools.partial(encoder_layer_kernel, head_num=head_num,
                               fuse_final_norm=fuse)
    # Weights/biases: full-array blocks with constant index_maps (no re-DMA across steps).
    param_specs = [pl.BlockSpec(p.shape, lambda b, n=p.ndim: (0,) * n) for p in params]

    d_ff = packed[6].shape[1]
    flops = 2 * B * S * (4 * D * D + 2 * S * D + 2 * D * d_ff)
    transcendentals = B * head_num * S * S
    bytes_accessed = 4 * (2 * B * S * D + B * Ms * S +
                          sum(int(np.prod(p.shape)) for p in params))
    cost = pl.CostEstimate(flops=flops, transcendentals=transcendentals,
                           bytes_accessed=bytes_accessed)

    return pl.pallas_call(
        kernel,
        out_shape=jax.ShapeDtypeStruct((B, S, D), jnp.float32),
        grid=(B,),
        in_specs=[pl.BlockSpec((1, S, D), lambda b: (b, 0, 0)),
                  pl.BlockSpec((1, Ms, S), lambda b: (b, 0, 0))] + param_specs,
        out_specs=pl.BlockSpec((1, S, D), lambda b: (b, 0, 0)),
        compiler_params=pltpu.CompilerParams(dimension_semantics=("parallel",)),
        cost_estimate=cost,
    )(x, mask, *params)


def encoder_forward(x, mask, layer_params, final_norm, head_num):
    packed = [pack_layer_params(p, head_num) for p in layer_params]
    n = len(packed)
    for i, lp in enumerate(packed):
        x = _run_layer(x, mask, lp, head_num,
                       final_norm=final_norm if i == n - 1 else None)
    return x


# ------------------------- parameter construction -------------------------
def _linear(key, fan_in, fan_out):
    # deterministic, torch.nn.Linear-style uniform init
    kw, kb = jax.random.split(key)
    bound = 1.0 / math.sqrt(fan_in)
    w = jax.random.uniform(kw, (fan_in, fan_out), jnp.float32, -bound, bound)
    b = jax.random.uniform(kb, (1, fan_out), jnp.float32, -bound, bound)
    return w, b


def init_encoder_params(key, d_model, N, head_num, d_ff):
    layer_params = []
    for _ in range(N):
        key, k1, k2, k3, k4, k5, k6 = jax.random.split(key, 7)
        wq, bq = _linear(k1, d_model, d_model)
        wk, bk = _linear(k2, d_model, d_model)
        wv, bv = _linear(k3, d_model, d_model)
        wo, bo = _linear(k4, d_model, d_model)
        g1 = jnp.ones((1, d_model), jnp.float32)
        be1 = jnp.zeros((1, d_model), jnp.float32)
        w1, c1 = _linear(k5, d_model, d_ff)
        w2, c2 = _linear(k6, d_ff, d_model)
        g2 = jnp.ones((1, d_model), jnp.float32)
        be2 = jnp.zeros((1, d_model), jnp.float32)
        layer_params.append((wq, bq, wk, bk, wv, bv, wo, bo,
                             g1, be1, w1, c1, w2, c2, g2, be2))
    final_norm = (jnp.ones((1, d_model), jnp.float32),
                  jnp.zeros((1, d_model), jnp.float32))
    return layer_params, final_norm


# ------------------------- pure-JAX reference -------------------------
def _reference(x, mask, layer_params, final_norm, head_num):
    def ln(x, g, b):
        d = x.shape[-1]
        mean = x.mean(-1, keepdims=True)
        var = ((x - mean) ** 2).sum(-1, keepdims=True) / (d - 1)
        return g * (x - mean) / (jnp.sqrt(var) + EPS) + b

    for (wq, bq, wk, bk, wv, bv, wo, bo, g1, be1,
         w1, c1, w2, c2, g2, be2) in layer_params:
        B, S, D = x.shape
        dk = D // head_num
        q = (x @ wq + bq[0]).reshape(B, S, head_num, dk).transpose(0, 2, 1, 3)
        k = (x @ wk + bk[0]).reshape(B, S, head_num, dk).transpose(0, 2, 1, 3)
        v = (x @ wv + bv[0]).reshape(B, S, head_num, dk).transpose(0, 2, 1, 3)
        scores = q @ k.transpose(0, 1, 3, 2) / math.sqrt(dk)
        scores = jnp.where(mask[:, None, :, :] == 0, -1e9, scores)
        attn = jax.nn.softmax(scores, axis=-1)
        heads = (attn @ v).transpose(0, 2, 1, 3).reshape(B, S, D)
        a = heads @ wo + bo[0]
        t = ln(x + a, g1[0], be1[0])
        z = jnp.maximum(t @ w1 + c1[0], 0.0) @ w2 + c2[0]
        x = ln(t + z, g2[0], be2[0])
    g, b = final_norm
    return ln(x, g[0], b[0])


if __name__ == "__main__":
    B, S, d_model, head_num, d_ff, N = 2, 8, 32, 4, 64, 2

    key = jax.random.PRNGKey(0)
    kx, kp = jax.random.split(key)
    x = jax.random.normal(kx, (B, S, d_model), jnp.float32)
    mask = jnp.ones((B, 1, S), jnp.float32)
    mask = mask.at[1, 0, 6:].set(0.0)  # mask out last two key positions of batch 1

    layer_params, final_norm = init_encoder_params(kp, d_model, N, head_num, d_ff)

    y = encoder_forward(x, mask, layer_params, final_norm, head_num)
    y = jax.block_until_ready(y)

    y_ref = _reference(x, mask, layer_params, final_norm, head_num)
    np.testing.assert_allclose(np.asarray(y), np.asarray(y_ref), rtol=1e-4, atol=1e-4)

    print("KERNEL_OK")
</pallas_src>

<mosaic_0001>
module attributes {stable_mosaic.version = 11 : i64} {
  func.func @encoder_layer_kernel(%arg0: i32, %arg1: memref<1x8x32xf32, #tpu.memory_space<vmem>>, %arg2: memref<1x1x8xf32, #tpu.memory_space<vmem>>, %arg3: memref<4x32x24xf32, #tpu.memory_space<vmem>>, %arg4: memref<4x1x24xf32, #tpu.memory_space<vmem>>, %arg5: memref<4x8x32xf32, #tpu.memory_space<vmem>>, %arg6: memref<1x32xf32, #tpu.memory_space<vmem>>, %arg7: memref<1x32xf32, #tpu.memory_space<vmem>>, %arg8: memref<1x32xf32, #tpu.memory_space<vmem>>, %arg9: memref<32x64xf32, #tpu.memory_space<vmem>>, %arg10: memref<1x64xf32, #tpu.memory_space<vmem>>, %arg11: memref<64x32xf32, #tpu.memory_space<vmem>>, %arg12: memref<1x32xf32, #tpu.memory_space<vmem>>, %arg13: memref<1x32xf32, #tpu.memory_space<vmem>>, %arg14: memref<1x32xf32, #tpu.memory_space<vmem>>, %arg15: memref<1x8x32xf32, #tpu.memory_space<vmem>>) attributes {dimension_semantics = [#tpu.dimension_semantics<parallel>], iteration_bounds = array<i64: 2>, scalar_prefetch = 0 : i64, scratch_operands = 0 : i64, tpu.core_type = #tpu.core_type<tc>, window_params = [{transform_indices = @transform_0, window_bounds = array<i64: 1, 8, 32>}, {transform_indices = @transform_1, window_bounds = array<i64: 1, 1, 8>}, {pipeline_mode = #tpu.pipeline_mode<synchronous>, transform_indices = @transform_2, window_bounds = array<i64: 4, 32, 24>}, {pipeline_mode = #tpu.pipeline_mode<synchronous>, transform_indices = @transform_3, window_bounds = array<i64: 4, 1, 24>}, {pipeline_mode = #tpu.pipeline_mode<synchronous>, transform_indices = @transform_4, window_bounds = array<i64: 4, 8, 32>}, {pipeline_mode = #tpu.pipeline_mode<synchronous>, transform_indices = @transform_5, window_bounds = array<i64: 1, 32>}, {pipeline_mode = #tpu.pipeline_mode<synchronous>, transform_indices = @transform_6, window_bounds = array<i64: 1, 32>}, {pipeline_mode = #tpu.pipeline_mode<synchronous>, transform_indices = @transform_7, window_bounds = array<i64: 1, 32>}, {pipeline_mode = #tpu.pipeline_mode<synchronous>, transform_indices = @transform_8, window_bounds = array<i64: 32, 64>}, {pipeline_mode = #tpu.pipeline_mode<synchronous>, transform_indices = @transform_9, window_bounds = array<i64: 1, 64>}, {pipeline_mode = #tpu.pipeline_mode<synchronous>, transform_indices = @transform_10, window_bounds = array<i64: 64, 32>}, {pipeline_mode = #tpu.pipeline_mode<synchronous>, transform_indices = @transform_11, window_bounds = array<i64: 1, 32>}, {pipeline_mode = #tpu.pipeline_mode<synchronous>, transform_indices = @transform_12, window_bounds = array<i64: 1, 32>}, {pipeline_mode = #tpu.pipeline_mode<synchronous>, transform_indices = @transform_13, window_bounds = array<i64: 1, 32>}, {transform_indices = @transform_14, window_bounds = array<i64: 1, 8, 32>}]} {
    %c0 = arith.constant 0 : index
    %c0_0 = arith.constant 0 : index
    %c0_1 = arith.constant 0 : index
    %0 = vector.load %arg1[%c0, %c0_0, %c0_1] : memref<1x8x32xf32, #tpu.memory_space<vmem>>, vector<1x8x32xf32>
    %1 = vector.shape_cast %0 : vector<1x8x32xf32> to vector<8x32xf32>
    %c0_2 = arith.constant 0 : index
    %c0_3 = arith.constant 0 : index
    %c0_4 = arith.constant 0 : index
    %2 = vector.load %arg2[%c0_2, %c0_3, %c0_4] : memref<1x1x8xf32, #tpu.memory_space<vmem>>, vector<1x1x8xf32>
    %3 = vector.shape_cast %2 : vector<1x1x8xf32> to vector<1x8xf32>
    %4 = vector.shape_cast %1 : vector<8x32xf32> to vector<1x8x32xf32>
    %5 = vector.shape_cast %4 : vector<1x8x32xf32> to vector<1x8x32xf32>
    %6 = vector.broadcast %5 : vector<1x8x32xf32> to vector<4x8x32xf32>
    %c0_5 = arith.constant 0 : index
    %c0_6 = arith.constant 0 : index
    %c0_7 = arith.constant 0 : index
    %7 = vector.load %arg3[%c0_5, %c0_6, %c0_7] : memref<4x32x24xf32, #tpu.memory_space<vmem>>, vector<4x32x24xf32>
    "tpu.trace_start"() <{level = 10 : i32, message = "hsd,hde->hse"}> : () -> ()
    %cst = arith.constant dense<0.000000e+00> : vector<4x8x24xf32>
    %8 = tpu.matmul %6, %7, %cst {dimension_numbers = #tpu.dot_dimension_numbers<[2], [1], [1], [2], [0, 0, 0, 1, 1, 2], [0], [0]>} : vector<4x8x32xf32>, vector<4x32x24xf32>, vector<4x8x24xf32> -> vector<4x8x24xf32>
    "tpu.trace_stop"() : () -> ()
    %c0_8 = arith.constant 0 : index
    %c0_9 = arith.constant 0 : index
    %c0_10 = arith.constant 0 : index
    %9 = vector.load %arg4[%c0_8, %c0_9, %c0_10] : memref<4x1x24xf32, #tpu.memory_space<vmem>>, vector<4x1x24xf32>
    %10 = vector.broadcast %9 : vector<4x1x24xf32> to vector<4x8x24xf32>
    %11 = arith.addf %8, %10 : vector<4x8x24xf32>
    %12 = vector.extract_strided_slice %11 {offsets = [0, 0, 0], sizes = [4, 8, 8], strides = [1, 1, 1]} : vector<4x8x24xf32> to vector<4x8x8xf32>
    %13 = vector.extract_strided_slice %11 {offsets = [0, 0, 8], sizes = [4, 8, 8], strides = [1, 1, 1]} : vector<4x8x24xf32> to vector<4x8x8xf32>
    %14 = vector.extract_strided_slice %11 {offsets = [0, 0, 16], sizes = [4, 8, 8], strides = [1, 1, 1]} : vector<4x8x24xf32> to vector<4x8x8xf32>
    "tpu.trace_start"() <{level = 10 : i32, message = "hsd,htd->hst"}> : () -> ()
    %cst_11 = arith.constant dense<0.000000e+00> : vector<4x8x8xf32>
    %15 = tpu.matmul %12, %13, %cst_11 {dimension_numbers = #tpu.dot_dimension_numbers<[2], [2], [1], [1], [0, 0, 0, 1, 1, 1], [0], [0]>} : vector<4x8x8xf32>, vector<4x8x8xf32>, vector<4x8x8xf32> -> vector<4x8x8xf32>
    "tpu.trace_stop"() : () -> ()
    %cst_12 = arith.constant 0.353553385 : f32
    %16 = vector.broadcast %cst_12 : f32 to vector<4x8x8xf32>
    %17 = arith.mulf %15, %16 : vector<4x8x8xf32>
    %18 = vector.shape_cast %3 : vector<1x8xf32> to vector<1x1x8xf32>
    %cst_13 = arith.constant 0.000000e+00 : f32
    %19 = vector.broadcast %cst_13 : f32 to vector<1x1x8xf32>
    %20 = arith.cmpf oeq, %18, %19 : vector<1x1x8xf32>
    %cst_14 = arith.constant -1.000000e+09 : f32
    %21 = vector.shape_cast %20 : vector<1x1x8xi1> to vector<1x1x8xi1>
    %22 = vector.broadcast %21 : vector<1x1x8xi1> to vector<4x8x8xi1>
    %23 = vector.broadcast %cst_14 : f32 to vector<4x8x8xf32>
    %24 = arith.select %22, %23, %17 : vector<4x8x8xi1>, vector<4x8x8xf32>
    %cst_15 = arith.constant dense<0xFF800000> : vector<4x8xf32>
    %25 = vector.multi_reduction <maximumf>, %24, %cst_15 [2] : vector<4x8x8xf32> to vector<4x8xf32>
    %26 = vector.shape_cast %25 : vector<4x8xf32> to vector<4x8x1xf32>
    %27 = vector.broadcast %26 : vector<4x8x1xf32> to vector<4x8x8xf32>
    %28 = arith.subf %24, %27 : vector<4x8x8xf32>
    %29 = math.exp %28 : vector<4x8x8xf32>
    %cst_16 = arith.constant dense<0.000000e+00> : vector<4x8xf32>
    %30 = vector.multi_reduction <add>, %29, %cst_16 [2] : vector<4x8x8xf32> to vector<4x8xf32>
    %31 = vector.shape_cast %30 : vector<4x8xf32> to vector<4x8x1xf32>
    %32 = vector.broadcast %31 : vector<4x8x1xf32> to vector<4x8x8xf32>
    %33 = arith.divf %29, %32 : vector<4x8x8xf32>
    "tpu.trace_start"() <{level = 10 : i32, message = "hst,htd->hsd"}> : () -> ()
    %cst_17 = arith.constant dense<0.000000e+00> : vector<4x8x8xf32>
    %34 = tpu.matmul %33, %14, %cst_17 {dimension_numbers = #tpu.dot_dimension_numbers<[2], [1], [1], [2], [0, 0, 0, 1, 1, 2], [0], [0]>} : vector<4x8x8xf32>, vector<4x8x8xf32>, vector<4x8x8xf32> -> vector<4x8x8xf32>
    "tpu.trace_stop"() : () -> ()
    %c0_18 = arith.constant 0 : index
    %c0_19 = arith.constant 0 : index
    %c0_20 = arith.constant 0 : index
    %35 = vector.load %arg5[%c0_18, %c0_19, %c0_20] : memref<4x8x32xf32, #tpu.memory_space<vmem>>, vector<4x8x32xf32>
    "tpu.trace_start"() <{level = 10 : i32, message = "hsd,hdj->hsj"}> : () -> ()
    %cst_21 = arith.constant dense<0.000000e+00> : vector<4x8x32xf32>
    %36 = tpu.matmul %34, %35, %cst_21 {dimension_numbers = #tpu.dot_dimension_numbers<[2], [1], [1], [2], [0, 0, 0, 1, 1, 2], [0], [0]>} : vector<4x8x8xf32>, vector<4x8x32xf32>, vector<4x8x32xf32> -> vector<4x8x32xf32>
    "tpu.trace_stop"() : () -> ()
    %cst_22 = arith.constant dense<0.000000e+00> : vector<8x32xf32>
    %37 = vector.multi_reduction <add>, %36, %cst_22 [0] : vector<4x8x32xf32> to vector<8x32xf32>
    %c0_23 = arith.constant 0 : index
    %c0_24 = arith.constant 0 : index
    %38 = vector.load %arg6[%c0_23, %c0_24] : memref<1x32xf32, #tpu.memory_space<vmem>>, vector<1x32xf32>
    %39 = vector.shape_cast %38 : vector<1x32xf32> to vector<32xf32>
    %40 = vector.shape_cast %39 : vector<32xf32> to vector<1x32xf32>
    %41 = vector.broadcast %40 : vector<1x32xf32> to vector<8x32xf32>
    %42 = arith.addf %37, %41 : vector<8x32xf32>
    %43 = arith.addf %1, %42 : vector<8x32xf32>
    %c0_25 = arith.constant 0 : index
    %c0_26 = arith.constant 0 : index
    %44 = vector.load %arg7[%c0_25, %c0_26] : memref<1x32xf32, #tpu.memory_space<vmem>>, vector<1x32xf32>
    %45 = vector.shape_cast %44 : vector<1x32xf32> to vector<32xf32>
    %c0_27 = arith.constant 0 : index
    %c0_28 = arith.constant 0 : index
    %46 = vector.load %arg8[%c0_27, %c0_28] : memref<1x32xf32, #tpu.memory_space<vmem>>, vector<1x32xf32>
    %47 = vector.shape_cast %46 : vector<1x32xf32> to vector<32xf32>
    %cst_29 = arith.constant dense<0.000000e+00> : vector<8xf32>
    %48 = vector.multi_reduction <add>, %43, %cst_29 [1] : vector<8x32xf32> to vector<8xf32>
    %49 = vector.shape_cast %48 : vector<8xf32> to vector<8x1xf32>
    %cst_30 = arith.constant 3.200000e+01 : f32
    %50 = vector.broadcast %cst_30 : f32 to vector<8x1xf32>
    %51 = arith.divf %49, %50 : vector<8x1xf32>
    %52 = vector.broadcast %51 : vector<8x1xf32> to vector<8x32xf32>
    %53 = arith.subf %43, %52 : vector<8x32xf32>
    %54 = arith.mulf %53, %53 : vector<8x32xf32>
    %cst_31 = arith.constant dense<0.000000e+00> : vector<8xf32>
    %55 = vector.multi_reduction <add>, %54, %cst_31 [1] : vector<8x32xf32> to vector<8xf32>
    %56 = vector.shape_cast %55 : vector<8xf32> to vector<8x1xf32>
    %cst_32 = arith.constant 3.100000e+01 : f32
    %57 = vector.broadcast %cst_32 : f32 to vector<8x1xf32>
    %58 = arith.divf %56, %57 : vector<8x1xf32>
    %59 = math.sqrt %58 : vector<8x1xf32>
    %60 = vector.broadcast %51 : vector<8x1xf32> to vector<8x32xf32>
    %61 = arith.subf %43, %60 : vector<8x32xf32>
    %62 = vector.shape_cast %45 : vector<32xf32> to vector<1x32xf32>
    %63 = vector.broadcast %62 : vector<1x32xf32> to vector<8x32xf32>
    %64 = arith.mulf %63, %61 : vector<8x32xf32>
    %cst_33 = arith.constant 9.99999974E-6 : f32
    %65 = vector.broadcast %cst_33 : f32 to vector<8x1xf32>
    %66 = arith.addf %59, %65 : vector<8x1xf32>
    %67 = vector.broadcast %66 : vector<8x1xf32> to vector<8x32xf32>
    %68 = arith.divf %64, %67 : vector<8x32xf32>
    %69 = vector.shape_cast %47 : vector<32xf32> to vector<1x32xf32>
    %70 = vector.broadcast %69 : vector<1x32xf32> to vector<8x32xf32>
    %71 = arith.addf %68, %70 : vector<8x32xf32>
    %c0_34 = arith.constant 0 : index
    %c0_35 = arith.constant 0 : index
    %72 = vector.load %arg9[%c0_34, %c0_35] : memref<32x64xf32, #tpu.memory_space<vmem>>, vector<32x64xf32>
    %cst_36 = arith.constant dense<0.000000e+00> : vector<8x64xf32>
    %73 = tpu.matmul %71, %72, %cst_36 {dimension_numbers = #tpu.dot_dimension_numbers<[1], [0], [0], [1], [0, 0, 1, 1], [], []>} : vector<8x32xf32>, vector<32x64xf32>, vector<8x64xf32> -> vector<8x64xf32>
    %c0_37 = arith.constant 0 : index
    %c0_38 = arith.constant 0 : index
    %74 = vector.load %arg10[%c0_37, %c0_38] : memref<1x64xf32, #tpu.memory_space<vmem>>, vector<1x64xf32>
    %75 = vector.shape_cast %74 : vector<1x64xf32> to vector<64xf32>
    %76 = vector.shape_cast %75 : vector<64xf32> to vector<1x64xf32>
    %77 = vector.broadcast %76 : vector<1x64xf32> to vector<8x64xf32>
    %78 = arith.addf %73, %77 : vector<8x64xf32>
    %cst_39 = arith.constant 0.000000e+00 : f32
    %79 = vector.broadcast %cst_39 : f32 to vector<8x64xf32>
    %80 = arith.maximumf %78, %79 : vector<8x64xf32>
    %c0_40 = arith.constant 0 : index
    %c0_41 = arith.constant 0 : index
    %81 = vector.load %arg11[%c0_40, %c0_41] : memref<64x32xf32, #tpu.memory_space<vmem>>, vector<64x32xf32>
    %cst_42 = arith.constant dense<0.000000e+00> : vector<8x32xf32>
    %82 = tpu.matmul %80, %81, %cst_42 {dimension_numbers = #tpu.dot_dimension_numbers<[1], [0], [0], [1], [0, 0, 1, 1], [], []>} : vector<8x64xf32>, vector<64x32xf32>, vector<8x32xf32> -> vector<8x32xf32>
    %c0_43 = arith.constant 0 : index
    %c0_44 = arith.constant 0 : index
    %83 = vector.load %arg12[%c0_43, %c0_44] : memref<1x32xf32, #tpu.memory_space<vmem>>, vector<1x32xf32>
    %84 = vector.shape_cast %83 : vector<1x32xf32> to vector<32xf32>
    %85 = vector.shape_cast %84 : vector<32xf32> to vector<1x32xf32>
    %86 = vector.broadcast %85 : vector<1x32xf32> to vector<8x32xf32>
    %87 = arith.addf %82, %86 : vector<8x32xf32>
    %88 = arith.addf %71, %87 : vector<8x32xf32>
    %c0_45 = arith.constant 0 : index
    %c0_46 = arith.constant 0 : index
    %89 = vector.load %arg13[%c0_45, %c0_46] : memref<1x32xf32, #tpu.memory_space<vmem>>, vector<1x32xf32>
    %90 = vector.shape_cast %89 : vector<1x32xf32> to vector<32xf32>
    %c0_47 = arith.constant 0 : index
    %c0_48 = arith.constant 0 : index
    %91 = vector.load %arg14[%c0_47, %c0_48] : memref<1x32xf32, #tpu.memory_space<vmem>>, vector<1x32xf32>
    %92 = vector.shape_cast %91 : vector<1x32xf32> to vector<32xf32>
    %cst_49 = arith.constant dense<0.000000e+00> : vector<8xf32>
    %93 = vector.multi_reduction <add>, %88, %cst_49 [1] : vector<8x32xf32> to vector<8xf32>
    %94 = vector.shape_cast %93 : vector<8xf32> to vector<8x1xf32>
    %cst_50 = arith.constant 3.200000e+01 : f32
    %95 = vector.broadcast %cst_50 : f32 to vector<8x1xf32>
    %96 = arith.divf %94, %95 : vector<8x1xf32>
    %97 = vector.broadcast %96 : vector<8x1xf32> to vector<8x32xf32>
    %98 = arith.subf %88, %97 : vector<8x32xf32>
    %99 = arith.mulf %98, %98 : vector<8x32xf32>
    %cst_51 = arith.constant dense<0.000000e+00> : vector<8xf32>
    %100 = vector.multi_reduction <add>, %99, %cst_51 [1] : vector<8x32xf32> to vector<8xf32>
    %101 = vector.shape_cast %100 : vector<8xf32> to vector<8x1xf32>
    %cst_52 = arith.constant 3.100000e+01 : f32
    %102 = vector.broadcast %cst_52 : f32 to vector<8x1xf32>
    %103 = arith.divf %101, %102 : vector<8x1xf32>
    %104 = math.sqrt %103 : vector<8x1xf32>
    %105 = vector.broadcast %96 : vector<8x1xf32> to vector<8x32xf32>
    %106 = arith.subf %88, %105 : vector<8x32xf32>
    %107 = vector.shape_cast %90 : vector<32xf32> to vector<1x32xf32>
    %108 = vector.broadcast %107 : vector<1x32xf32> to vector<8x32xf32>
    %109 = arith.mulf %108, %106 : vector<8x32xf32>
    %cst_53 = arith.constant 9.99999974E-6 : f32
    %110 = vector.broadcast %cst_53 : f32 to vector<8x1xf32>
    %111 = arith.addf %104, %110 : vector<8x1xf32>
    %112 = vector.broadcast %111 : vector<8x1xf32> to vector<8x32xf32>
    %113 = arith.divf %109, %112 : vector<8x32xf32>
    %114 = vector.shape_cast %92 : vector<32xf32> to vector<1x32xf32>
    %115 = vector.broadcast %114 : vector<1x32xf32> to vector<8x32xf32>
    %116 = arith.addf %113, %115 : vector<8x32xf32>
    %c0_54 = arith.constant 0 : index
    %c0_55 = arith.constant 0 : index
    %c0_56 = arith.constant 0 : index
    %117 = vector.load %arg15[%c0_54, %c0_55, %c0_56] : memref<1x8x32xf32, #tpu.memory_space<vmem>>, vector<1x8x32xf32>
    %118 = vector.shape_cast %117 : vector<1x8x32xf32> to vector<8x32xf32>
    %119 = vector.shape_cast %116 : vector<8x32xf32> to vector<1x8x32xf32>
    tpu.vector_store %arg15[%c0_54, %c0_55, %c0_56], %119 {strides = array<i32>} : memref<1x8x32xf32, #tpu.memory_space<vmem>>, vector<1x8x32xf32>,
    return
  }
  func.func @transform_0(%arg0: i32) -> (i32, i32, i32) {
    %c0_i32 = arith.constant 0 : i32
    %c0_i32_0 = arith.constant 0 : i32
    %c0_i32_1 = arith.constant 0 : i32
    return %arg0, %c0_i32, %c0_i32_0 : i32, i32, i32
  }
  func.func @transform_1(%arg0: i32) -> (i32, i32, i32) {
    %c0_i32 = arith.constant 0 : i32
    %c0_i32_0 = arith.constant 0 : i32
    %c0_i32_1 = arith.constant 0 : i32
    return %arg0, %c0_i32, %c0_i32_0 : i32, i32, i32
  }
  func.func @transform_2(%arg0: i32) -> (i32, i32, i32) {
    %c0_i32 = arith.constant 0 : i32
    %c0_i32_0 = arith.constant 0 : i32
    %c0_i32_1 = arith.constant 0 : i32
    %c0_i32_2 = arith.constant 0 : i32
    return %c0_i32, %c0_i32_0, %c0_i32_1 : i32, i32, i32
  }
  func.func @transform_3(%arg0: i32) -> (i32, i32, i32) {
    %c0_i32 = arith.constant 0 : i32
    %c0_i32_0 = arith.constant 0 : i32
    %c0_i32_1 = arith.constant 0 : i32
    %c0_i32_2 = arith.constant 0 : i32
    return %c0_i32, %c0_i32_0, %c0_i32_1 : i32, i32, i32
  }
  func.func @transform_4(%arg0: i32) -> (i32, i32, i32) {
    %c0_i32 = arith.constant 0 : i32
    %c0_i32_0 = arith.constant 0 : i32
    %c0_i32_1 = arith.constant 0 : i32
    %c0_i32_2 = arith.constant 0 : i32
    return %c0_i32, %c0_i32_0, %c0_i32_1 : i32, i32, i32
  }
  func.func @transform_5(%arg0: i32) -> (i32, i32) {
    %c0_i32 = arith.constant 0 : i32
    %c0_i32_0 = arith.constant 0 : i32
    %c0_i32_1 = arith.constant 0 : i32
    return %c0_i32, %c0_i32_0 : i32, i32
  }
  func.func @transform_6(%arg0: i32) -> (i32, i32) {
    %c0_i32 = arith.constant 0 : i32
    %c0_i32_0 = arith.constant 0 : i32
    %c0_i32_1 = arith.constant 0 : i32
    return %c0_i32, %c0_i32_0 : i32, i32
  }
  func.func @transform_7(%arg0: i32) -> (i32, i32) {
    %c0_i32 = arith.constant 0 : i32
    %c0_i32_0 = arith.constant 0 : i32
    %c0_i32_1 = arith.constant 0 : i32
    return %c0_i32, %c0_i32_0 : i32, i32
  }
  func.func @transform_8(%arg0: i32) -> (i32, i32) {
    %c0_i32 = arith.constant 0 : i32
    %c0_i32_0 = arith.constant 0 : i32
    %c0_i32_1 = arith.constant 0 : i32
    return %c0_i32, %c0_i32_0 : i32, i32
  }
  func.func @transform_9(%arg0: i32) -> (i32, i32) {
    %c0_i32 = arith.constant 0 : i32
    %c0_i32_0 = arith.constant 0 : i32
    %c0_i32_1 = arith.constant 0 : i32
    return %c0_i32, %c0_i32_0 : i32, i32
  }
  func.func @transform_10(%arg0: i32) -> (i32, i32) {
    %c0_i32 = arith.constant 0 : i32
    %c0_i32_0 = arith.constant 0 : i32
    %c0_i32_1 = arith.constant 0 : i32
    return %c0_i32, %c0_i32_0 : i32, i32
  }
  func.func @transform_11(%arg0: i32) -> (i32, i32) {
    %c0_i32 = arith.constant 0 : i32
    %c0_i32_0 = arith.constant 0 : i32
    %c0_i32_1 = arith.constant 0 : i32
    return %c0_i32, %c0_i32_0 : i32, i32
  }
  func.func @transform_12(%arg0: i32) -> (i32, i32) {
    %c0_i32 = arith.constant 0 : i32
    %c0_i32_0 = arith.constant 0 : i32
    %c0_i32_1 = arith.constant 0 : i32
    return %c0_i32, %c0_i32_0 : i32, i32
  }
  func.func @transform_13(%arg0: i32) -> (i32, i32) {
    %c0_i32 = arith.constant 0 : i32
    %c0_i32_0 = arith.constant 0 : i32
    %c0_i32_1 = arith.constant 0 : i32
    return %c0_i32, %c0_i32_0 : i32, i32
  }
  func.func @transform_14(%arg0: i32) -> (i32, i32, i32) {
    %c0_i32 = arith.constant 0 : i32
    %c0_i32_0 = arith.constant 0 : i32
    %c0_i32_1 = arith.constant 0 : i32
    return %arg0, %c0_i32, %c0_i32_0 : i32, i32, i32
  }
}

</mosaic_0001>

<bundles_post_ra>
// kernel: tpu_custom_call.1
= control target key start
LH: loop header
LB: loop body
LE: loop exit
PB: predicated region body
PF: predicated region fallthrough
CT: control target
= control target key end

     0   :  { %s2941_s0 = inlined_call_operand.vmem [shape: f32[2,8,32], index: 0, kind: input, shape index: {}]   ;;  %s2942_s1 = inlined_call_operand.vmem [shape: f32[2,1,8], index: 1, kind: input, shape index: {}]   ;;  %s2943_s2 = inlined_call_operand.vmem [shape: f32[4,32,24], index: 2, kind: input, shape index: {}]   ;;  %s2944_s3 = inlined_call_operand.vmem [shape: f32[4,1,24], index: 3, kind: input, shape index: {}]   ;;  %s2945_s4 = inlined_call_operand.vmem [shape: f32[4,8,32], index: 4, kind: input, shape index: {}]   ;;  %s2946_s5 = inlined_call_operand.vmem [shape: f32[1,32], index: 5, kind: input, shape index: {}]   ;;  %s2947_s6 = inlined_call_operand.vmem [shape: f32[1,32], index: 6, kind: input, shape index: {}]   ;;  %s2948_s7 = inlined_call_operand.vmem [shape: f32[1,32], index: 7, kind: input, shape index: {}]   ;;  %s2949_s8 = inlined_call_operand.vmem [shape: f32[32,64], index: 8, kind: input, shape index: {}]   ;;  %s2950_s9 = inlined_call_operand.vmem [shape: f32[1,64], index: 9, kind: input, shape index: {}]   ;;  %s2951_s10 = inlined_call_operand.vmem [shape: f32[64,32], index: 10, kind: input, shape index: {}]   ;;  %s2952_s11 = inlined_call_operand.vmem [shape: f32[1,32], index: 11, kind: input, shape index: {}]   ;;  %s2953_s12 = inlined_call_operand.vmem [shape: f32[1,32], index: 12, kind: input, shape index: {}]   ;;  %s2954_s13 = inlined_call_operand.vmem [shape: f32[1,32], index: 13, kind: input, shape index: {}]   ;;  %s2955_s14 = inlined_call_operand.hbm [shape: f32[2,8,32], index: 14, kind: output, shape index: {}]  }
   0x1   :  { %2959 = sst [smem:[#allocation8_spill]] %s2941_s0 }
   0x2   :  { %2960 = sst [smem:[#allocation9_spill]] %s2942_s1 }
   0x3   :  { %19 = vsyncpa [#allocation3], 0 }
   0x4   :  { %21 = vsyncpa [#allocation3 + $0x1], 0  ;;  %s2569_s29 = smov 0   ;;  %s2571_s30 = smov 0  }
   0x5   :  { %s2573_s15 = smov 0   ;;  %s2575_s16 = smov 0  }
   0x6 LB: > { %2961 = sst [smem:[#allocation5_spill]] %s2482_s15  ;;  %s2590_s17 = sadd.s32 4294967295, %s2486_s16   ;;  %s2486_s16 = sphi %s2575_s16, %s2968_s16   ;;  %s2482_s15 = sphi %s2573_s15, %s2970_s15   ;;  %s2478_s30 = sphi %s2571_s30, %s2972_s30   ;;  %s2474_s29 = sphi %s2569_s29, %s2971_s29  }
   0x7   : > { %s2123_s18 = sadd.s32 4294967294, %s2486_s16   ;;  %s2594_s19 = sadd.s32 1, %s2486_s16  }
   0x8   : > { %2962 = sst [smem:[#allocation6_spill]] %s2594_s19  ;;  %s338_s20 = sadd.s32 1, %s2482_s15 }
   0x9   : > { %s335_s21 = ssub.s32 %s2486_s16, %s2594_s19  ;;  %p348_p0 = scmp.ne.s32.totalorder %s2482_s15, %s2478_s30 }
   0xa   : > { %p336_p1 = scmp.eq.s32.totalorder %s335_s21, 0  ;;  %p349_p2 = scmp.eq.s32.totalorder %s2590_s17, 1 }
   0xb   : > { %p354_p3 = scmp.ne.s32.totalorder %s2478_s30, %s2474_s29  ;;  %p355_p4 = scmp.eq.s32.totalorder %s2123_s18, 1 }
   0xc   : > { %s2605_s22 = scalar_select %p336_p1, %s2482_s15, %s338_s20  }
   0xd   : > { %p2607_p5 = por %p349_p2, %p348_p0  ;;  %p2611_p6 = por %p355_p4, %p354_p3 }
   0xe   : > { %2963 = sst [smem:[#allocation7_spill]] %s2605_s22  ;;  %p2126_p7 = scmp.ge.s32.totalorder %s2486_s16, 1 }
   0xf   : > { %p422_p8 = scmp.lt.s32.totalorder %s2486_s16, 3 }
  0x11   : > { %p423_p9 = pnand %p2126_p7, %p422_p8 }
  0x12   : > { %p470_p10 = scmp.lt.s32.totalorder (!%p423_p9), %s2590_s17, 1  ;;  %s2966_s0 = sld [smem:[#allocation8_spill]] (!%p423_p9) }
  0x13   : > { %426 = sbr.rel (%p423_p9) target bundleno = 2315 (0x90b), region = 76  ;;  %s2490_s18 = smov (!%p423_p9), 120  }
  0x14   : > { %s2967_s1 = sld [smem:[#allocation9_spill]] (!%p423_p9)  ;;  %s2493_s27 = smov (!%p423_p9), [#allocation2]  }
  0x15   : > { %s2430_s28 = sshll.u32 (!%p423_p9), %s2493_s27, 4  ;;  %s2431_s28 = int_to_ptr.vmem [resolvable:$false] %s2430_s28 }
  0x18   : > { %v482_v0 = vld [vmem:[%s2943_s2 + $0x18] sm:$0xff]  ;;  %v2488_v2 = vmov 0.0   ;;  %v481_v3 = vld [vmem:[%s2943_s2 + $0x10] sm:$0xff]  ;;  %s2633_s25 = scalar_select %p470_p10, %s2590_s17, 1  ;;  %v480_v5 = vld [vmem:[%s2943_s2 + $0x8] sm:$0xff]  ;;  %vm2489_vm0 = vmmov 0   ;;  %v1122_v38 = vlaneseq }
  0x19   : > { %v486_v1 = vld [vmem:[%s2943_s2 + $0x38] sm:$0xff]  ;;  %2224 = vmatprep.subr.mxu0 %v2488_v2  ;;  %2235 = vmatprep.subr.mxu1 %v2488_v2  ;;  %v485_v4 = vld [vmem:[%s2943_s2 + $0x30] sm:$0xff]  ;;  %v484_v6 = vld [vmem:[%s2943_s2 + $0x28] sm:$0xff]  ;;  %vm523_vm1 = vcmask 261120   ;;  %vm810_vm2 = vcmask 64512   ;;  %v2491_v42 = vmov 0  }
  0x1a   : > { %2225 = vmatpush3.msra.mxu0 %v482_v0  ;;  %2236 = vmatpush3.msra.mxu1 %v486_v1  ;;  %s2128_s22 = sshll.u32 %s2633_s25, 3  ;;  %v479_v7 = vld [vmem:[%s2943_s2] sm:$0xff]  ;;  %v490_v10 = vld [vmem:[%s2943_s2 + $0x58] sm:$0xff]  ;;  %v489_v11 = vld [vmem:[%s2943_s2 + $0x50] sm:$0xff]  ;;  %s476_s15 = scalar_lea.vmem %s2967_s1, %s2633_s25  ;;  %v1123_v40 = vshrl.u32 %v1122_v38, 7  ;;  %vm1929_vm7 = vcmask 523264  }
  0x1b   : > { %2226 = vmatprep.subr.mxu0 %v2488_v2  ;;  %2237 = vmatprep.subr.mxu1 %v2488_v2  ;;  %s473_s26 = scalar_lea.vmem %s2966_s0, %s2128_s22  ;;  %v483_v9 = vld [vmem:[%s2943_s2 + $0x20] sm:$0xff]  ;;  %v494_v12 = vld [vmem:[%s2943_s2 + $0x78] sm:$0xff]  ;;  %v488_v13 = vld [vmem:[%s2943_s2 + $0x48] sm:$0xff]  ;;  %s2492_s25 = smov 112  }
  0x1c   : > { %2227 = vmatpush3.msra.mxu0 %v481_v3  ;;  %2238 = vmatpush3.msra.mxu1 %v485_v4  ;;  %v2654_v8 = vld [vmem:[%s473_s26] sm:$0xff]  ;;  %v493_v14 = vld [vmem:[%s2943_s2 + $0x70] sm:$0xff]  ;;  %v492_v16 = vld [vmem:[%s2943_s2 + $0x68] sm:$0xff]  ;;  %v1124_v41 = vsub.s32 0, %v1123_v40  ;;  %s467_s22 = sand.u32 1, %s2478_s30  }
  0x1d   : > { %2228 = vmatprep.subr.mxu0 %v2488_v2  ;;  %2239 = vmatprep.subr.mxu1 %v2488_v2  ;;  %v487_v15 = vld [vmem:[%s2943_s2 + $0x40] sm:$0xff]  ;;  %v1480_v40 = vld [vmem:[%s2945_s4 + $0x8] sm:$0xff]  ;;  %s2127_s20 = sshll.u32 %s467_s22, 3  ;;  %s2042_s21 = scalar_lea.sflag [#allocation3], %s467_s22 }
  0x1e   : > { %2229 = vmatpush3.msra.mxu0 %v480_v5  ;;  %2232 = vmatprep.mubr.msk.f32.mxu0 %vm2489_vm0, %v2488_v2  ;;  %v491_v17 = vld [vmem:[%s2943_s2 + $0x60] sm:$0xff] }
  0x1f   : > { %2230 = vmatprep.subr.mxu0 %v2488_v2  ;;  %2240 = vmatpush3.msra.mxu1 %v484_v6  ;;  %v2129_v18 = vld [vmem:[%s2944_s3] ss:$0 sm:$0xff]  ;;  %v2130_v20 = vld [vmem:[%s2944_s3 + $0x1] ss:$0 sm:$0xff]  ;;  %v2131_v26 = vld [vmem:[%s2944_s3 + $0x2] ss:$0 sm:$0xff] }
  0x20   : > { %2231 = vmatpush3.msra.mxu0 %v479_v7  ;;  %2241 = vmatprep.subr.mxu1 %v2488_v2  ;;  %v2132_v29 = vld [vmem:[%s2944_s3 + $0x3] ss:$0 sm:$0xff]  ;;  %v478_v39 = vld [vmem:[%s476_s15] sm:$0x1]  ;;  %s2163_s15 = sshll.u32 %s2590_s17, 7  ;;  %s2432_s17 = scalar_lea.vmem %s2431_s28, 256 }
  0x21   : > { %2233 = vmatmul.mubr.msk.f32.vlgmr.msra.gmra.mxu0 %vm523_vm1, %v2654_v8  ;;  %2246 = vmatprep.subr.mxu0 %v2488_v2  ;;  %vm1120_vm3 = vcmp.eq.f32.partialorder %v478_v39, 0.0  ;;  %v1479_v39 = vld [vmem:[%s2945_s4] sm:$0xff]  ;;  %s2053_s1 = scalar_lea.hbm %s2955_s14, %s2163_s15 }
  0x22   : > { %2242 = vmatpush3.msra.mxu1 %v483_v9  ;;  %2243 = vmatprep.mubr.msk.f32.mxu1 %vm2489_vm0, %v2488_v2  ;;  %v1121_v43 = vsel %vm1120_vm3, 1, %v2491_v42 }
  0x23   : > { %2247 = vmatpush3.msra.mxu0 %v490_v10  ;;  %2244 = vmatmul.mubr.msk.f32.vlgmr.msra.gmra.mxu1 %vm523_vm1, %v2654_v8  ;;  %v1125_v44 = vrot.slane %v1121_v43, %v1124_v41  ;;  %v1481_v41 = vld [vmem:[%s2945_s4 + $0x10] sm:$0xff] }
  0x24   : > { %2248 = vmatprep.subr.mxu0 %v2488_v2  ;;  %2257 = vmatprep.subr.mxu1 %v2488_v2 }
  0x25   : > { %2249 = vmatpush3.msra.mxu0 %v489_v11  ;;  %2258 = vmatpush3.msra.mxu1 %v494_v12  ;;  %vm1126_vm4 = vcmp.eq.s32.totalorder %v1125_v44, 1  ;;  %v1482_v44 = vld [vmem:[%s2945_s4 + $0x18] sm:$0xff] }
  0x26   : > { %2250 = vmatprep.subr.mxu0 %v2488_v2  ;;  %2259 = vmatprep.subr.mxu1 %v2488_v2 }
  0x27   : > { %2251 = vmatpush3.msra.mxu0 %v488_v13  ;;  %2260 = vmatpush3.msra.mxu1 %v493_v14 }
  0x28   : > { %2252 = vmatprep.subr.mxu0 %v2488_v2  ;;  %2261 = vmatprep.subr.mxu1 %v2488_v2 }
  0x29   : > { %2253 = vmatpush3.msra.mxu0 %v487_v15  ;;  %2254 = vmatprep.mubr.msk.f32.mxu0 %vm2489_vm0, %v2488_v2 }
  0x2a   : > { %2262 = vmatpush3.msra.mxu1 %v492_v16  ;;  %2255 = vmatmul.mubr.msk.f32.vlgmr.msra.gmra.mxu0 %vm523_vm1, %v2654_v8 }
  0x2b   : > { %2263 = vmatprep.subr.mxu1 %v2488_v2  ;;  %2265 = vmatprep.mubr.msk.f32.mxu1 %vm2489_vm0, %v2488_v2 }
  0x2c   : > { %2264 = vmatpush3.msra.mxu1 %v491_v17  ;;  %2268 = vmatprep.subr.mxu0 %v2488_v2 }
  0x2d   : > { %2266 = vmatmul.mubr.msk.f32.vlgmr.msra.gmra.mxu1 %vm523_vm1, %v2654_v8  ;;  %2270 = vmatprep.mubr.msk.f32.mxu0 %vm2489_vm0, %v2488_v2 }
  0x2e   : > { %2283 = vmatprep.subr.mxu1 %v2488_v2  ;;  %2285 = vmatprep.mubr.msk.f32.mxu1 %vm2489_vm0, %v2488_v2 }
  0xe1   : > { %v593_v19 = vpop.f32.mrf.mxu0 }
  0xe2   : > { %v2719_v21 = vadd.f32 %v2129_v18, %v593_v19 }
  0xe3   : > { %v2234_v22 = vpop.f32.mrf.mxu0  ;;  %v663_v23 = vpop.f32.mrf.mxu1 }
  0xe4   : > { %v2721_v24 = vadd.f32 %v2130_v20, %v663_v23  ;;  %808 = vrot.lane.b32.xlu0 %v2719_v21, %s2490_s18 }
  0xe5   : > { %v2245_v25 = vpop.f32.mrf.mxu1 }
  0xe8   : > { %886 = vrot.lane.b32.xlu0 %v2721_v24, %s2490_s18 }
  0xea   : > { %v733_v27 = vpop.f32.mrf.mxu0 }
  0xeb   : > { %v2728_v28 = vadd.f32 %v2131_v26, %v733_v27 }
  0xec   : > { %v2256_v30 = vpop.f32.mrf.mxu0 }
  0xed   : > { %v803_v31 = vpop.f32.mrf.mxu1  ;;  %963 = vrot.lane.b32.xlu1 %v2728_v28, %s2490_s18 }
  0xee   : > { %v2734_v32 = vadd.f32 %v2132_v29, %v803_v31 }
  0xef   : > { %v2267_v33 = vpop.f32.mrf.mxu1 }
  0xf1   : > { %1040 = vrot.lane.b32.xlu1 %v2734_v32, %s2490_s18 }
 0x156   : > { %v809_v34 = vpop.permute.xlu0 %808 }
 0x157   : > { %2269 = vmatpush3.xpose.msk.msra.mxu0 %vm810_vm2, %v809_v34 }
 0x158   : > { %2273 = vmatprep.subr.mxu0 %v2488_v2 }
 0x15a   : > { %2271 = vmatmul.mubr.msk.f32.vlgmr.msra.gmra.mxu0 %vm810_vm2, %v2719_v21  ;;  %v887_v35 = vpop.permute.xlu0 %886 }
 0x15b   : > { %2274 = vmatpush3.xpose.msk.msra.mxu0 %vm810_vm2, %v887_v35  ;;  %2275 = vmatprep.mubr.msk.f32.mxu0 %vm2489_vm0, %v2488_v2 }
 0x15c   : > { %2278 = vmatprep.subr.mxu0 %v2488_v2 }
 0x15e   : > { %2276 = vmatmul.mubr.msk.f32.vlgmr.msra.gmra.mxu0 %vm810_vm2, %v2721_v24 }
 0x15f   : > { %v964_v36 = vpop.permute.xlu1 %963  ;;  %2280 = vmatprep.mubr.msk.f32.mxu0 %vm2489_vm0, %v2488_v2 }
 0x160   : > { %2279 = vmatpush3.xpose.msk.msra.mxu0 %vm810_vm2, %v964_v36 }
 0x161   : > { %2288 = vmatprep.subr.mxu0 %v2488_v2 }
 0x163   : > { %2281 = vmatmul.mubr.msk.f32.vlgmr.msra.gmra.mxu0 %vm810_vm2, %v2728_v28  ;;  %v1041_v37 = vpop.permute.xlu1 %1040 }
 0x164   : > { %2284 = vmatpush3.xpose.msk.msra.mxu1 %vm810_vm2, %v1041_v37  ;;  %2290 = vmatprep.mubr.msk.f32.mxu0 %vm2489_vm0, %v2488_v2 }
 0x165   : > { %2293 = vmatprep.subr.mxu1 %v2488_v2 }
 0x167   : > { %2286 = vmatmul.mubr.msk.f32.vlgmr.msra.gmra.mxu1 %vm810_vm2, %v2734_v32 }
 0x168   : > { %2295 = vmatprep.mubr.msk.f32.mxu1 %vm2489_vm0, %v2488_v2 }
 0x21a   : > { %v881_v45 = vpop.f32.mrf.mxu0 }
 0x21b   : > { %v1116_v46 = vmul.f32 0.35355338, %v881_v45 }
 0x21c   : > { %v2272_v47 = vpop.f32.mrf.mxu0 }
 0x21d   : > { %v1127_v48 = vsel %vm1126_vm4, -1e+09, %v1116_v46 }
 0x21e   : > { %v958_v49 = vpop.f32.mrf.mxu0  ;;  %v1131_v50 = vsel %vm810_vm2, %v1127_v48, -inf }
 0x21f   : > { %v1117_v51 = vmul.f32 0.35355338, %v958_v49  ;;  %1132 = vmax.xlane.f32.xlu0 %v1131_v50 }
 0x220   : > { %v2277_v52 = vpop.f32.mrf.mxu0 }
 0x221   : > { %v1128_v53 = vsel %vm1126_vm4, -1e+09, %v1117_v51 }
 0x222   : > { %v1134_v54 = vsel %vm810_vm2, %v1128_v53, -inf }
 0x223   : > { %v1035_v55 = vpop.f32.mrf.mxu0  ;;  %1135 = vmax.xlane.f32.xlu1 %v1134_v54 }
 0x224   : > { %v1118_v56 = vmul.f32 0.35355338, %v1035_v55 }
 0x225   : > { %v2282_v57 = vpop.f32.mrf.mxu0 }
 0x226   : > { %v1129_v58 = vsel %vm1126_vm4, -1e+09, %v1118_v56 }
 0x227   : > { %v1112_v59 = vpop.f32.mrf.mxu1  ;;  %v1137_v60 = vsel %vm810_vm2, %v1129_v58, -inf }
 0x228   : > { %v1119_v61 = vmul.f32 0.35355338, %v1112_v59  ;;  %1138 = vmax.xlane.f32.xlu0 %v1137_v60 }
 0x229   : > { %v2287_v62 = vpop.f32.mrf.mxu1 }
 0x22a   : > { %v1130_v63 = vsel %vm1126_vm4, -1e+09, %v1119_v61 }
 0x22b   : > { %v1140_v0 = vsel %vm810_vm2, %v1130_v63, -inf }
 0x22c   : > { %1141 = vmax.xlane.f32.xlu0 %v1140_v0  ;;  %v2153_v0 = vld [vmem:[%s2946_s5] ss:$0 sm:$0xff] }
 0x234   : > { %1175 = vrot.lane.b32.xlu1 %v2719_v21, %s2492_s25 }
 0x2a8   : > { %v1133_v1 = vpop.xlane.xlu0 %1132 }
 0x2a9   : > { %v1143_v3 = vsub.f32 %v1127_v48, %v1133_v1 }
 0x2ab   : > { %v1147_v4 = vmul.f32 1.442695, %v1143_v3 }
 0x2ac   : > { %v1136_v5 = vpop.xlane.xlu1 %1135 }
 0x2ad   : > { %2402 = vpow2.f32 %v1147_v4  ;;  %v1144_v6 = vsub.f32 %v1128_v53, %v1136_v5 }
 0x2af   : > { %v1149_v7 = vmul.f32 1.442695, %v1144_v6 }
 0x2b0   : > { %v1176_v9 = vpop.permute.xlu1 %1175 }
 0x2b1   : > { %2404 = vpow2.f32 %v1149_v7  ;;  %v1139_v10 = vpop.xlane.xlu0 %1138  ;;  %2289 = vmatpush3.msra.mxu0 %v1176_v9 }
 0x2b2   : > { %v1145_v11 = vsub.f32 %v1129_v58, %v1139_v10  ;;  %2298 = vmatprep.subr.mxu0 %v2488_v2 }
 0x2b4   : > { %v1151_v12 = vmul.f32 1.442695, %v1145_v11 }
 0x2b5   : > { %v1142_v13 = vpop.xlane.xlu0 %1141 }
 0x2b6   : > { %2406 = vpow2.f32 %v1151_v12  ;;  %v1146_v14 = vsub.f32 %v1130_v63, %v1142_v13  ;;  %v1832_v13 = vld [vmem:[%s2949_s8 + $0x18] sm:$0xff] }
 0x2b8   : > { %v1153_v15 = vmul.f32 1.442695, %v1146_v14  ;;  %v1831_v14 = vld [vmem:[%s2949_s8 + $0x10] sm:$0xff] }
 0x2ba   : > { %v2403_v16 = vpop.eup %2402  ;;  %2408 = vpow2.f32 %v1153_v15  ;;  %v1829_v15 = vld [vmem:[%s2949_s8] sm:$0xff] }
 0x2bb   : > { %v1155_v17 = vsel %vm810_vm2, %v2403_v16, 0.0 }
 0x2bc   : > { %1156 = vadd.xlane.f32.xlu1 %v1155_v17  ;;  %v1920_v17 = vld [vmem:[%s2951_s10 + $0x30] sm:$0xff] }
 0x2be   : > { %v2405_v18 = vpop.eup %2404 }
 0x2bf   : > { %v1158_v19 = vsel %vm810_vm2, %v2405_v18, 0.0 }
 0x2c0   : > { %1159 = vadd.xlane.f32.xlu0 %v1158_v19  ;;  %v1918_v19 = vld [vmem:[%s2951_s10 + $0x20] sm:$0xff] }
 0x2c3   : > { %v2407_v20 = vpop.eup %2406 }
 0x2c4   : > { %v1161_v21 = vsel %vm810_vm2, %v2407_v20, 0.0 }
 0x2c5   : > { %1162 = vadd.xlane.f32.xlu1 %v1161_v21 }
 0x2c7   : > { %v2409_v22 = vpop.eup %2408 }
 0x2c8   : > { %v1164_v23 = vsel %vm810_vm2, %v2409_v22, 0.0 }
 0x2c9   : > { %1165 = vadd.xlane.f32.xlu0 %v1164_v23 }
 0x2d6   : > { %1327 = vrot.lane.b32.xlu1 %v2728_v28, %s2492_s25 }
 0x2da   : > { %1403 = vrot.lane.b32.xlu1 %v2734_v32, %s2492_s25 }
 0x2df   : > { %1251 = vrot.lane.b32.xlu0 %v2721_v24, %s2492_s25  ;;  %s469_s25 = scalar_lea.vmem [#allocation2], %s2127_s20 }
 0x2e0   : > { %s2055_s19 = sshll.u32 %s469_s25, 4  ;;  %s2056_s19 = int_to_ptr.vmem [resolvable:$true] %s2055_s19 }
 0x2e1   : > { %s2426_s26 = scalar_lea.vmem %s2056_s19, 128  ;;  %p2433_p0 = scmp.lt.s32.totalorder %s2056_s19, %s2431_s28 }
 0x2e2   : > { %p2427_p11 = scmp.ne.s32.totalorder %s2056_s19, %s2426_s26  ;;  %p2434_p1 = scmp.lt.s32.totalorder %s2432_s17, %s2426_s26 }
 0x2e4   : > { %p2428_p12 = pnand %p2427_p11, %p2607_p5  ;;  %p2435_p2 = por %p2434_p1, %p2433_p0 }
 0x2e6   : > { %p2429_p13 = pneg %p2428_p12 }
 0x2e8   : > { %p2436_p3 = pnand %p2435_p2, %p2429_p13 }
 0x345   : > { %v1157_v25 = vpop.xlane.xlu1 %1156 }
 0x346   : > { %2410 = vrcp.f32 %v1157_v25 }
 0x349   : > { %v1160_v26 = vpop.xlane.xlu0 %1159 }
 0x34a   : > { %2412 = vrcp.f32 %v1160_v26 }
 0x34e   : > { %v1163_v27 = vpop.xlane.xlu1 %1162 }
 0x34f   : > { %2414 = vrcp.f32 %v1163_v27 }
 0x352   : > { %v1166_v29 = vpop.xlane.xlu0 %1165  ;;  %v1328_v31 = vpop.permute.xlu1 %1327 }
 0x353   : > { %v2411_v30 = vpop.eup %2410  ;;  %2416 = vrcp.f32 %v1166_v29 }
 0x354   : > { %v1168_v33 = vmul.f32 %v2411_v30, %v2403_v16  ;;  %v1921_v16 = vld [vmem:[%s2951_s10 + $0x38] sm:$0xff] }
 0x356   : > { %v1252_v34 = vpop.permute.xlu0 %1251  ;;  %2291 = vmatmul.mubr.msk.f32.vlgmr.msra.gmra.mxu0 %vm810_vm2, %v1168_v33  ;;  %v1404_v32 = vpop.permute.xlu1 %1403 }
 0x357   : > { %v2413_v28 = vpop.eup %2412  ;;  %2294 = vmatpush3.msra.mxu1 %v1252_v34  ;;  %2299 = vmatpush3.msra.mxu0 %v1328_v31  ;;  %v2154_v31 = vld [vmem:[%s2947_s6] ss:$0 sm:$0xff] }
 0x358   : > { %2303 = vmatprep.subr.mxu1 %v2488_v2  ;;  %v1170_v24 = vmul.f32 %v2413_v28, %v2405_v18  ;;  %2300 = vmatprep.mubr.msk.f32.mxu0 %vm2489_vm0, %v2488_v2  ;;  %v1919_v18 = vld [vmem:[%s2951_s10 + $0x28] sm:$0xff]  ;;  %v2155_v28 = vld [vmem:[%s2948_s7] ss:$0 sm:$0xff] }
 0x359   : > { %2308 = vmatprep.subr.mxu0 %v2488_v2 }
 0x35a   : > { %2296 = vmatmul.mubr.msk.f32.vlgmr.msra.gmra.mxu1 %vm810_vm2, %v1170_v24 }
 0x35b   : > { %2304 = vmatpush3.msra.mxu1 %v1404_v32  ;;  %2305 = vmatprep.mubr.msk.f32.mxu1 %vm2489_vm0, %v2488_v2 }
 0x35c   : > { %v2415_v35 = vpop.eup %2414  ;;  %2313 = vmatprep.subr.mxu1 %v2488_v2 }
 0x35d   : > { %v1172_v36 = vmul.f32 %v2415_v35, %v2407_v20  ;;  %v1917_v20 = vld [vmem:[%s2951_s10 + $0x18] sm:$0xff]  ;;  %v1916_v35 = vld [vmem:[%s2951_s10 + $0x10] sm:$0xff] }
 0x35f   : > { %2301 = vmatmul.mubr.msk.f32.vlgmr.msra.gmra.mxu0 %vm810_vm2, %v1172_v36  ;;  %v1915_v36 = vld [vmem:[%s2951_s10 + $0x8] sm:$0xff] }
 0x360   : > { %v2417_v37 = vpop.eup %2416  ;;  %2310 = vmatprep.mubr.msk.f32.mxu0 %vm2489_vm0, %v2488_v2  ;;  %2309 = vmatpush3.msra.mxu0 %v1479_v39 }
 0x361   : > { %v1174_v38 = vmul.f32 %v2417_v37, %v2409_v22  ;;  %2318 = vmatprep.subr.mxu0 %v2488_v2  ;;  %v1914_v37 = vld [vmem:[%s2951_s10] sm:$0xff] }
 0x363   : > { %2306 = vmatmul.mubr.msk.f32.vlgmr.msra.gmra.mxu1 %vm810_vm2, %v1174_v38  ;;  %v2156_v38 = vld [vmem:[%s2950_s9] ss:$0 sm:$0xff] }
 0x364   : > { %2315 = vmatprep.mubr.msk.f32.mxu1 %vm2489_vm0, %v2488_v2  ;;  %2314 = vmatpush3.msra.mxu1 %v1480_v40 }
 0x365   : > { %2323 = vmatprep.subr.mxu1 %v2488_v2 }
 0x416   : > { %v1247_v42 = vpop.f32.mrf.mxu0 }
 0x417   : > { %2311 = vmatmul.mubr.msk.f32.vlgmr.msra.gmra.mxu0 %vm810_vm2, %v1247_v42 }
 0x418   : > { %v2292_v43 = vpop.f32.mrf.mxu0  ;;  %2319 = vmatpush3.msra.mxu0 %v1481_v41  ;;  %2320 = vmatprep.mubr.msk.f32.mxu0 %vm2489_vm0, %v2488_v2 }
 0x419   : > { %2328 = vmatprep.subr.mxu0 %v2488_v2  ;;  %v2158_v43 = vld [vmem:[%s2952_s11] ss:$0 sm:$0xff] }
 0x41a   : > { %v1323_v45 = vpop.f32.mrf.mxu1 }
 0x41b   : > { %2316 = vmatmul.mubr.msk.f32.vlgmr.msra.gmra.mxu1 %vm810_vm2, %v1323_v45 }
 0x41c   : > { %v2297_v46 = vpop.f32.mrf.mxu1  ;;  %2324 = vmatpush3.msra.mxu1 %v1482_v44  ;;  %2325 = vmatprep.mubr.msk.f32.mxu1 %vm2489_vm0, %v2488_v2 }
 0x41d   : > { %2339 = vmatprep.subr.mxu1 %v2488_v2 }
 0x41f   : > { %v1399_v47 = vpop.f32.mrf.mxu0 }
 0x420   : > { %2321 = vmatmul.mubr.msk.f32.vlgmr.msra.gmra.mxu0 %vm810_vm2, %v1399_v47 }
 0x421   : > { %v2302_v48 = vpop.f32.mrf.mxu0  ;;  %2336 = vmatprep.mubr.msk.f32.mxu0 %vm2489_vm0, %v2488_v2  ;;  %2329 = vmatpush3.msra.mxu0 %v1832_v13 }
 0x422   : > { %2330 = vmatprep.subr.mxu0 %v2488_v2 }
 0x423   : > { %v1475_v49 = vpop.f32.mrf.mxu1  ;;  %2331 = vmatpush3.msra.mxu0 %v1831_v14 }
 0x424   : > { %2326 = vmatmul.mubr.msk.f32.vlgmr.msra.gmra.mxu1 %vm810_vm2, %v1475_v49  ;;  %2332 = vmatprep.subr.mxu0 %v2488_v2 }
 0x425   : > { %v2307_v50 = vpop.f32.mrf.mxu1  ;;  %2355 = vmatprep.mubr.msk.f32.mxu1 %vm2489_vm0, %v2488_v2  ;;  %2340 = vmatpush3.msra.mxu1 %v1921_v16 }
 0x426   : > { %2341 = vmatprep.subr.mxu1 %v2488_v2 }
 0x427   : > { %2342 = vmatpush3.msra.mxu1 %v1920_v17 }
 0x428   : > { %2343 = vmatprep.subr.mxu1 %v2488_v2 }
 0x429   : > { %2344 = vmatpush3.msra.mxu1 %v1919_v18 }
 0x42a   : > { %2345 = vmatprep.subr.mxu1 %v2488_v2 }
 0x42b   : > { %2346 = vmatpush3.msra.mxu1 %v1918_v19 }
 0x42c   : > { %2347 = vmatprep.subr.mxu1 %v2488_v2 }
 0x42d   : > { %2348 = vmatpush3.msra.mxu1 %v1917_v20 }
 0x42e   : > { %2349 = vmatprep.subr.mxu1 %v2488_v2 }
 0x42f   : > { %2350 = vmatpush3.msra.mxu1 %v1916_v35 }
 0x430   : > { %2351 = vmatprep.subr.mxu1 %v2488_v2 }
 0x431   : > { %2352 = vmatpush3.msra.mxu1 %v1915_v36 }
 0x432   : > { %2353 = vmatprep.subr.mxu1 %v2488_v2 }
 0x433   : > { %2354 = vmatpush3.msra.mxu1 %v1914_v37 }
 0x4d7   : > { %v1552_v51 = vpop.f32.mrf.mxu0 }
 0x4d8   : > { %v1775_v57 = vsel %vm523_vm1, %v1552_v51, 0.0 }
 0x4d9   : > { %v2312_v52 = vpop.f32.mrf.mxu0 }
 0x4db   : > { %v1625_v53 = vpop.f32.mrf.mxu1 }
 0x4dc   : > { %v1776_v55 = vsel %vm523_vm1, %v1625_v53, 0.0 }
 0x4dd   : > { %v2317_v54 = vpop.f32.mrf.mxu1  ;;  %v1777_v59 = vadd.f32 %v1776_v55, %v1775_v57 }
 0x4e0   : > { %v1698_v56 = vpop.f32.mrf.mxu0 }
 0x4e1   : > { %v1778_v58 = vsel %vm523_vm1, %v1698_v56, 0.0 }
 0x4e2   : > { %v2322_v60 = vpop.f32.mrf.mxu0  ;;  %v1779_v61 = vadd.f32 %v1778_v58, %v1777_v59 }
 0x4e4   : > { %v1771_v62 = vpop.f32.mrf.mxu1 }
 0x4e5   : > { %v1780_v63 = vsel %vm523_vm1, %v1771_v62, 0.0 }
 0x4e6   : > { %v1781_v1 = vadd.f32 %v1780_v63, %v1779_v61  ;;  %v2327_v3 = vpop.f32.mrf.mxu1  ;;  %v2160_v61 = vld [vmem:[%s2953_s12] ss:$0 sm:$0xff] }
 0x4e8   : > { %v1789_v4 = vadd.f32 %v2153_v0, %v1781_v1  ;;  %v2161_v0 = vld [vmem:[%s2954_s13] ss:$0 sm:$0xff] }
 0x4ea   : > { %v1790_v5 = vadd.f32 %v1789_v4, %v2654_v8  ;;  %v1830_v8 = vld [vmem:[%s2949_s8 + $0x8] sm:$0xff] }
 0x4eb   : > { %2333 = vmatpush3.msra.mxu0 %v1830_v8 }
 0x4ec   : > { %v1793_v6 = vsel %vm523_vm1, %v1790_v5, 0.0  ;;  %2334 = vmatprep.subr.mxu0 %v2488_v2 }
 0x4ed   : > { %1794 = vadd.xlane.f32.xlu0 %v1793_v6  ;;  %2335 = vmatpush3.msra.mxu0 %v1829_v15 }
 0x576   : > { %v1795_v7 = vpop.xlane.xlu0 %1794 }
 0x577   : > { %v1797_v9 = vmul.f32 0.03125, %v1795_v7 }
 0x579   : > { %v1798_v10 = vsub.f32 %v1790_v5, %v1797_v9 }
 0x57b   : > { %v1799_v11 = vmul.f32 %v1798_v10, %v1798_v10  ;;  %v1818_v33 = vmul.f32 %v2154_v31, %v1798_v10 }
 0x57d   : > { %v1800_v12 = vsel %vm523_vm1, %v1799_v11, 0.0 }
 0x57e   : > { %1801 = vadd.xlane.f32.xlu1 %v1800_v12 }
 0x607   : > { %v1802_v21 = vpop.xlane.xlu1 %1801 }
 0x608   : > { %v1804_v22 = vmul.f32 0.032258064, %v1802_v21 }
 0x60a   : > { %2418 = vrsqrt.f32 %v1804_v22  ;;  %vm1807_vm5 = vcmp.eq.f32.partialorder %v1804_v22, inf  ;;  %v1810_v26 = vand.u32 2147483648, %v1804_v22  ;;  %vm1809_vm6 = vcmp.eq.f32.partialorder %v1804_v22, 0.0 }
 0x617   : > { %v2419_v23 = vpop.eup %2418 }
 0x618   : > { %v1806_v25 = vmul.f32 %v2419_v23, %v1804_v22 }
 0x61a   : > { %v1808_v27 = vsel %vm1807_vm5, %v1804_v22, %v1806_v25 }
 0x61b   : > { %v1811_v29 = vsel %vm1809_vm6, %v1810_v26, %v1808_v27 }
 0x61c   : > { %v1819_v30 = vadd.f32 1e-05, %v1811_v29 }
 0x61e   : > { %2420 = vrcp.f32 %v1819_v30 }
 0x62b   : > { %v2421_v34 = vpop.eup %2420 }
 0x62c   : > { %v1821_v24 = vmul.f32 %v2421_v34, %v1818_v33 }
 0x62e   : > { %v1828_v32 = vadd.f32 %v2155_v28, %v1821_v24 }
 0x630   : > { %2337 = vmatmul.mubr.msk.f32.vlgmr.msra.gmra.mxu0 %vm523_vm1, %v1828_v32 }
 0x6f0   : > { %v1909_v39 = vpop.f32.mrf.mxu0 }
 0x6f1   : > { %v1910_v40 = vadd.f32 %v2156_v38, %v1909_v39 }
 0x6f2   : > { %v2338_v41 = vpop.f32.mrf.mxu0 }
 0x6f3   : > { %v1913_v42 = vmax.f32 %v1910_v40, 0.0 }
 0x6f5   : > { %2356 = vmatmul.mubr.msk.f32.vlgmr.msra.gmra.mxu1 %vm1929_vm7, %v1913_v42 }
 0x7b5   : > { %v1999_v44 = vpop.f32.mrf.mxu1 }
 0x7b6   : > { %v2000_v45 = vadd.f32 %v2158_v43, %v1999_v44 }
 0x7b7   : > { %v2357_v46 = vpop.f32.mrf.mxu1 }
 0x7b8   : > { %v2003_v47 = vadd.f32 %v2000_v45, %v1828_v32 }
 0x7ba   : > { %v2006_v2 = vsel %vm523_vm1, %v2003_v47, 0.0 }
 0x7bb   : > { %2007 = vadd.xlane.f32.xlu0 %v2006_v2 }
 0x844   : > { %v2008_v48 = vpop.xlane.xlu0 %2007 }
 0x845   : > { %v2009_v49 = vmul.f32 0.03125, %v2008_v48 }
 0x847   : > { %v2010_v50 = vsub.f32 %v2003_v47, %v2009_v49 }
 0x849   : > { %v2011_v51 = vmul.f32 %v2010_v50, %v2010_v50  ;;  %v2029_v62 = vmul.f32 %v2160_v61, %v2010_v50 }
 0x84b   : > { %v2012_v52 = vsel %vm523_vm1, %v2011_v51, 0.0 }
 0x84c   : > { %2013 = vadd.xlane.f32.xlu0 %v2012_v52 }
 0x8d5   : > { %v2014_v53 = vpop.xlane.xlu0 %2013 }
 0x8d6   : > { %v2015_v54 = vmul.f32 0.032258064, %v2014_v53 }
 0x8d8   : > { %2422 = vrsqrt.f32 %v2015_v54  ;;  %vm2018_vm8 = vcmp.eq.f32.partialorder %v2015_v54, inf  ;;  %v2021_v57 = vand.u32 2147483648, %v2015_v54  ;;  %vm2020_vm9 = vcmp.eq.f32.partialorder %v2015_v54, 0.0 }
 0x8e5   : > { %v2423_v55 = vpop.eup %2422 }
 0x8e6   : > { %v2017_v56 = vmul.f32 %v2423_v55, %v2015_v54 }
 0x8e8   : > { %v2019_v58 = vsel %vm2018_vm8, %v2015_v54, %v2017_v56 }
 0x8e9   : > { %v2022_v59 = vsel %vm2020_vm9, %v2021_v57, %v2019_v58 }
 0x8ea   : > { %v2030_v60 = vadd.f32 1e-05, %v2022_v59 }
 0x8ec   : > { %2424 = vrcp.f32 %v2030_v60 }
 0x8f9   : > { %v2425_v63 = vpop.eup %2424 }
 0x8fa   : > { %v2032_v1 = vmul.f32 %v2425_v63, %v2029_v62 }
 0x8fc   : > { %v2039_v3 = vadd.f32 %v2161_v0, %v2032_v1 }
 0x8fe   : > { %2040 = vst.msk [vmem:[%s469_s25] sm:$0xff] %vm523_vm1, %v2039_v3 }
 0x8ff   : > { %2439 = shalt.err (!%p2436_p3)
}
 0x900   : > { %s2440_s0 = scalar_lea.hbm %s2053_s1, 128  ;;  %s2444_s15 = scalar_lea.hbm %s2955_s14, 256 }
 0x901   : > { %p2441_p4 = scmp.ne.s32.totalorder %s2053_s1, %s2440_s0  ;;  %p2445_p9 = scmp.lt.s32.totalorder %s2053_s1, %s2955_s14 }
 0x902   : > { %p2446_p10 = scmp.lt.s32.totalorder %s2444_s15, %s2440_s0 }
 0x903   : > { %p2442_p7 = pnand %p2441_p4, %p2607_p5 }
 0x904   : > { %p2447_p11 = por %p2446_p10, %p2445_p9 }
 0x905   : > { %p2443_p8 = pneg %p2442_p7 }
 0x907   : > { %p2448_p12 = pnand %p2447_p11, %p2443_p8 }
 0x909   : > { %2451 = shalt.err (!%p2448_p12)
}
 0x90a   : > { %2358 = dma.vmem_to_hbm [thread:$0]  (%p2607_p5), %s2056_s19, 128, %s2053_s1, %s2042_s21  }
 0x90b PF: > { %p2364_p13 = scmp.ge.s32.totalorder %s2486_s16, 2  ;;  %s2067_s26 = sand.u32 1, %s2474_s29  }
 0x90c   : > { %s2068_s27 = scalar_lea.sflag [#allocation3], %s2067_s26 }
 0x90d   : > { %p2361_p0 = pnand %p2364_p13, %p2611_p6 }
 0x90f   : > { %p2362_p1 = pneg %p2361_p0 }
 0x911   : > { %2469 = dma.done.wait (%p2362_p1), %s2068_s27, 128  }
 0x912   : > { %2471 = vsyncadd (%p2362_p1), %s2068_s27, 4294967168  ;;  %s2968_s16 = sld [smem:[#allocation6_spill]]  ;;  %s2971_s29 = smov %s2478_s30 }
 0x913   : > { %s2969_s28 = sld [smem:[#allocation5_spill]] }
 0x914   : > { %s2970_s15 = sld [smem:[#allocation7_spill]] }
 0x918   : > { %p24_p2 = scmp.ge.s32.totalorder %s2968_s16, 4  }
 0x919   : > { %s2972_s30 = smov %s2969_s28 }
 0x91a   :  { %26 = sbr.rel (!%p24_p2) target bundleno = 6 (0x6), region = 114 }
 0x91f   :  { %2073 = vsyncpa [#allocation3], 1 }
 0x920   :  { %2075 = vsyncpa [#allocation3 + $0x1], 1 }

</bundles_post_ra>
